<compile_context>
chip_gen: v6e
topology: v6e:2x2x1
jax: 0.10.0
libtpu: 0.0.40
codegen_flags: <defaults>
</compile_context>

<pallas_src>
import jax
import jax.numpy as jnp
from jax.experimental import pallas as pl
from jax.experimental.pallas import tpu as pltpu

# ----------------- static config (MarkLayerConfig equivalent) -----------------
NUM_HEADS = 4
SUB_HEADS = 2
JO, JQ, JT = 2, 2, 2
INPUT_DIM = 32
USE_WEIGHT = True
ACTIVATION = "logsigmoid"      # 'identity' | 'tanh' | 'logsigmoid'
ACTIVATION_SCALE = 2.0

H_SUB = NUM_HEADS // SUB_HEADS
D_SUB = INPUT_DIM // SUB_HEADS
M_TOTAL = NUM_HEADS * JO * JQ * JT          # 32, flattened (h, jo, jq, jt), final order

# Max lane-pack factor: fold this many consecutive rows into the 128-lane axis.
MAX_LANE_PACK = (128 // M_TOTAL) if (M_TOTAL <= 128 and 128 % M_TOTAL == 0) else 1
TILE_R = 8192                                # packed rows per grid step (32768 x-rows)
VMEM_LIMIT_BYTES = 40 * 1024 * 1024          # 2x(in+out) tiles ~16 MiB + headroom


# ------------------------------- activations ----------------------------------
def _log_sigmoid(x):
    # numerically stable log(sigmoid(x)) = min(x, 0) - log1p(exp(-|x|))
    return jnp.minimum(x, 0.0) - jnp.log1p(jnp.exp(-jnp.abs(x)))


def _activation_ref(x):
    if ACTIVATION == "identity":
        return x
    elif ACTIVATION == "tanh":
        return ACTIVATION_SCALE * jnp.tanh(x / ACTIVATION_SCALE)
    elif ACTIVATION == "logsigmoid":
        return jnp.exp(ACTIVATION_SCALE * _log_sigmoid(x))
    raise ValueError("Bad source activation")


def _activation_kernel(x):
    if ACTIVATION == "identity":
        return x
    elif ACTIVATION == "tanh":
        return ACTIVATION_SCALE * jnp.tanh(x / ACTIVATION_SCALE)
    elif ACTIVATION == "logsigmoid":
        # exp(scale * logsigmoid(x)) == sigmoid(x) ** scale
        # approx=False keeps bit-accuracy vs. the rtol=1e-5 reference check;
        # flip to approx=True (EUP vrcp, free slot) if tolerance allows.
        s = pl.reciprocal(1.0 + jnp.exp(-x), approx=False)
        if ACTIVATION_SCALE == 2.0:
            return s * s
        elif ACTIVATION_SCALE == 1.0:
            return s
        else:
            return jnp.exp(ACTIVATION_SCALE * _log_sigmoid(x))
    raise ValueError("Bad source activation")


# --------------------------------- kernels ------------------------------------
def mark_kernel(x_ref, w_ref, b_ref, o_ref):
    # x_ref: [TILE_R, pack*INPUT_DIM], w_ref: [pack*IN, pack*M], b_ref: [1, pack*M]
    acc = jnp.dot(x_ref[...], w_ref[...], preferred_element_type=jnp.float32)
    acc = acc + b_ref[...].astype(jnp.float32)         # bias broadcast over rows
    o_ref[...] = _activation_kernel(acc).astype(o_ref.dtype)


def mark_bias_only_kernel(b_ref, o_ref):
    # weight=False path: output is activation(bias), broadcast outside the kernel.
    o_ref[...] = _activation_kernel(b_ref[...].astype(jnp.float32)).astype(o_ref.dtype)


# ------------------------- trace-time parameter packing ------------------------
def _pack_params(weight, bias, pack):
    # weight: [H_SUB, S, JO, JQ, JT, D_SUB]
    # Block-diagonal over sub-heads, columns in final head order h = h_sub*S + s:
    #   W_bd[s_row*D_SUB + d, ((h_sub*S + s_col)*JO + jo)*JQ*JT + ...] =
    #       weight[h_sub, s_col, jo, jq, jt, d] * (s_row == s_col)
    eye_s = jnp.eye(SUB_HEADS, dtype=weight.dtype)
    w_bd = jnp.einsum('hsijkd,st->sdhtijk', weight, eye_s).reshape(INPUT_DIM, M_TOTAL)
    # Lane-packed weight: kron(I_pack, W_bd) so [rows, pack*IN] @ W gives
    # [rows, pack*M] where each M_TOTAL-lane group is one original row's output.
    w_full = jnp.kron(jnp.eye(pack, dtype=weight.dtype), w_bd)
    b_row = jnp.tile(bias.reshape(1, M_TOTAL), (1, pack))
    return w_full, b_row


def _choose_pack(n):
    # Largest pack in {MAX_LANE_PACK, ..., 2, 1} that divides n exactly
    # (avoids a jnp.pad HBM copy of x for ragged row counts).
    p = MAX_LANE_PACK
    while p > 1 and n % p != 0:
        p //= 2
    return max(p, 1)


# --------------------------------- wrapper -------------------------------------
def mark_layer(x, weight, bias):
    lead = x.shape[:-1]
    n = 1
    for d in lead:
        n *= d

    if not USE_WEIGHT:
        b2 = bias.reshape(NUM_HEADS, JO * JQ * JT)
        act = pl.pallas_call(
            mark_bias_only_kernel,
            out_shape=jax.ShapeDtypeStruct(b2.shape, x.dtype),
        )(b2)
        act = act.reshape(NUM_HEADS, JO, JQ, JT)
        return jnp.broadcast_to(act, (*lead, NUM_HEADS, JO, JQ, JT))

    pack = _choose_pack(n)
    rows = n // pack
    kx = pack * INPUT_DIM           # 128 when pack == 4
    km = pack * M_TOTAL             # 128 when pack == 4

    x2 = x.reshape(n, INPUT_DIM)
    x_lane = x2.reshape(rows, kx)   # free view: same contiguous HBM bytes

    # NOTE: packing is tiny trace-time work; under jit it is folded into the
    # graph once per weight value (no per-step cost).
    w_full, b_row = _pack_params(weight, bias, pack)

    tile_r = min(TILE_R, rows)
    grid = (pl.cdiv(rows, tile_r),)

    cost = pl.CostEstimate(
        flops=2 * rows * kx * km,
        transcendentals=2 * rows * km,          # exp + reciprocal per element
        bytes_accessed=4 * (rows * (kx + km) + kx * km + km),
    )

    out = pl.pallas_call(
        mark_kernel,
        out_shape=jax.ShapeDtypeStruct((rows, km), x.dtype),
        grid_spec=pltpu.PrefetchScalarGridSpec(
            num_scalar_prefetch=0,
            grid=grid,
            in_specs=[
                pl.BlockSpec((tile_r, kx), lambda i: (i, 0)),
                pl.BlockSpec((kx, km), lambda i: (0, 0)),
                pl.BlockSpec((1, km), lambda i: (0, 0)),
            ],
            out_specs=pl.BlockSpec((tile_r, km), lambda i: (i, 0)),
        ),
        compiler_params=pltpu.CompilerParams(
            dimension_semantics=("parallel",),     # pipelined + v7x megacore
            vmem_limit_bytes=VMEM_LIMIT_BYTES,
        ),
        cost_estimate=cost,
    )(x_lane, w_full, b_row)

    # [rows, pack*M] is the same bytes as [n, M]; free reshapes only.
    out = out.reshape(n, M_TOTAL)
    return out.reshape(*lead, NUM_HEADS, JO, JQ, JT)


# ---------------------------- pure-JAX reference ------------------------------
def ref_forward(x, weight, bias):
    xr = x.reshape(*x.shape[:-1], SUB_HEADS, D_SUB)
    if USE_WEIGHT:
        res = jnp.einsum('hsijkd,...sd->...hsijk', weight, xr)
        res = res.reshape(*x.shape[:-1], NUM_HEADS, JO, JQ, JT) + bias
    else:
        res = jnp.broadcast_to(bias, (*x.shape[:-1], NUM_HEADS, JO, JQ, JT))
    return _activation_ref(res)


# ----------------------------------- main --------------------------------------
if __name__ == "__main__":
    key = jax.random.PRNGKey(0)
    kx_key, kw_key, kb_key = jax.random.split(key, 3)

    # deterministic synthetic parameters (reset_parameters() init is config-defined)
    weight = 0.1 * jax.random.normal(
        kw_key, (H_SUB, SUB_HEADS, JO, JQ, JT, D_SUB), jnp.float32)
    bias = 0.1 * jax.random.normal(kb_key, (NUM_HEADS, JO, JQ, JT), jnp.float32)

    # small input consistent with the module: leading dims (batch=2, seq=8)
    x = jax.random.normal(kx_key, (2, 8, INPUT_DIM), jnp.float32)

    out = mark_layer(x, weight, bias)
    out = jax.block_until_ready(out)

    ref = ref_forward(x, weight, bias)
    assert out.shape == (2, 8, NUM_HEADS, JO, JQ, JT), out.shape
    assert jnp.allclose(out, ref, rtol=1e-5, atol=1e-5), \
        float(jnp.max(jnp.abs(out - ref)))

    print("KERNEL_OK")
</pallas_src>

<mosaic_0001>
module attributes {stable_mosaic.version = 11 : i64} {
  func.func @mark_kernel(%arg0: i32, %arg1: memref<4x128xf32, #tpu.memory_space<vmem>>, %arg2: memref<128x128xf32, #tpu.memory_space<vmem>>, %arg3: memref<1x128xf32, #tpu.memory_space<vmem>>, %arg4: memref<4x128xf32, #tpu.memory_space<vmem>>) attributes {dimension_semantics = [#tpu.dimension_semantics<parallel>], iteration_bounds = array<i64: 1>, scalar_prefetch = 0 : i64, scratch_operands = 0 : i64, tpu.core_type = #tpu.core_type<tc>, window_params = [{transform_indices = @transform_0, window_bounds = array<i64: 4, 128>}, {pipeline_mode = #tpu.pipeline_mode<synchronous>, transform_indices = @transform_1, window_bounds = array<i64: 128, 128>}, {pipeline_mode = #tpu.pipeline_mode<synchronous>, transform_indices = @transform_2, window_bounds = array<i64: 1, 128>}, {transform_indices = @transform_3, window_bounds = array<i64: 4, 128>}]} {
    %c0 = arith.constant 0 : index
    %c0_0 = arith.constant 0 : index
    %0 = vector.load %arg1[%c0, %c0_0] : memref<4x128xf32, #tpu.memory_space<vmem>>, vector<4x128xf32>
    %c0_1 = arith.constant 0 : index
    %c0_2 = arith.constant 0 : index
    %1 = vector.load %arg2[%c0_1, %c0_2] : memref<128x128xf32, #tpu.memory_space<vmem>>, vector<128x128xf32>
    %cst = arith.constant dense<0.000000e+00> : vector<4x128xf32>
    %2 = tpu.matmul %0, %1, %cst {dimension_numbers = #tpu.dot_dimension_numbers<[1], [0], [0], [1], [0, 0, 1, 1], [], []>} : vector<4x128xf32>, vector<128x128xf32>, vector<4x128xf32> -> vector<4x128xf32>
    %c0_3 = arith.constant 0 : index
    %c0_4 = arith.constant 0 : index
    %3 = vector.load %arg3[%c0_3, %c0_4] : memref<1x128xf32, #tpu.memory_space<vmem>>, vector<1x128xf32>
    %4 = vector.broadcast %3 : vector<1x128xf32> to vector<4x128xf32>
    %5 = arith.addf %2, %4 : vector<4x128xf32>
    %cst_5 = arith.constant 0.000000e+00 : f32
    %6 = vector.broadcast %cst_5 : f32 to vector<4x128xf32>
    %7 = arith.subf %6, %5 : vector<4x128xf32>
    %8 = math.exp %7 : vector<4x128xf32>
    %cst_6 = arith.constant 1.000000e+00 : f32
    %9 = vector.broadcast %cst_6 : f32 to vector<4x128xf32>
    %10 = arith.addf %9, %8 : vector<4x128xf32>
    %11 = tpu.reciprocal %10 : vector<4x128xf32> -> vector<4x128xf32>
    %12 = arith.mulf %11, %11 : vector<4x128xf32>
    %c0_7 = arith.constant 0 : index
    %c0_8 = arith.constant 0 : index
    %13 = vector.load %arg4[%c0_7, %c0_8] : memref<4x128xf32, #tpu.memory_space<vmem>>, vector<4x128xf32>
    tpu.vector_store %arg4[%c0_7, %c0_8], %12 {strides = array<i32>} : memref<4x128xf32, #tpu.memory_space<vmem>>, vector<4x128xf32>,
    return
  }
  func.func @transform_0(%arg0: i32) -> (i32, i32) {
    %c0_i32 = arith.constant 0 : i32
    %c0_i32_0 = arith.constant 0 : i32
    return %arg0, %c0_i32 : i32, i32
  }
  func.func @transform_1(%arg0: i32) -> (i32, i32) {
    %c0_i32 = arith.constant 0 : i32
    %c0_i32_0 = arith.constant 0 : i32
    %c0_i32_1 = arith.constant 0 : i32
    return %c0_i32, %c0_i32_0 : i32, i32
  }
  func.func @transform_2(%arg0: i32) -> (i32, i32) {
    %c0_i32 = arith.constant 0 : i32
    %c0_i32_0 = arith.constant 0 : i32
    %c0_i32_1 = arith.constant 0 : i32
    return %c0_i32, %c0_i32_0 : i32, i32
  }
  func.func @transform_3(%arg0: i32) -> (i32, i32) {
    %c0_i32 = arith.constant 0 : i32
    %c0_i32_0 = arith.constant 0 : i32
    return %arg0, %c0_i32 : i32, i32
  }
}

</mosaic_0001>

<bundles_post_ra>
// kernel: tpu_custom_call.1
= control target key start
LH: loop header
LB: loop body
LE: loop exit
PB: predicated region body
PF: predicated region fallthrough
CT: control target
= control target key end

     0   :  { %8 = vsyncpa [#allocation3], 0  ;;  %s327_s0 = inlined_call_operand.hbm [shape: f32[4,128], index: 0, kind: input, shape index: {}]   ;;  %s328_s1 = inlined_call_operand.hbm [shape: f32[128,128], index: 1, kind: input, shape index: {}]   ;;  %s329_s2 = inlined_call_operand.vmem [shape: f32[1,128], index: 2, kind: input, shape index: {}]   ;;  %s330_s3 = inlined_call_operand.hbm [shape: f32[4,128], index: 3, kind: output, shape index: {}]  }
   0x1   :  { %9 = vsyncpa [#allocation6], 0 }
   0x2   :  { %10 = vsyncpa [#allocation4], 0  ;;  %s288_s12 = smov [#allocation2]   ;;  %s289_s14 = smov [#allocation5]  }
   0x3   :  { %s17_s13 = sshll.u32 %s288_s12, 4  ;;  %s26_s15 = sshll.u32 %s289_s14, 4  ;;  %s18_s13 = int_to_ptr.vmem [resolvable:$true] %s17_s13  ;;  %s27_s15 = int_to_ptr.vmem [resolvable:$true] %s26_s15 }
   0x4   :  { %s230_s16 = scalar_lea.vmem %s18_s13, 64  ;;  %p235_p1 = scmp.lt.s32.totalorder %s18_s13, %s18_s13 }
   0x5   :  { %p231_p0 = scmp.ne.s32.totalorder %s18_s13, %s230_s16  ;;  %p236_p2 = scmp.lt.s32.totalorder %s230_s16, %s230_s16 }
   0x7   :  { %p237_p3 = por %p236_p2, %p235_p1 }
   0x9   :  { %p238_p4 = pnand %p237_p3, %p231_p0 }
   0xb   :  { %241 = shalt.err (!%p238_p4)
}
   0xc   :  { %20 = dma.hbm_to_vmem [thread:$0]  %s327_s0, 64, %s18_s13, [#allocation3]  }
   0xd   :  { %s250_s19 = scalar_lea.vmem %s27_s15, 2048  ;;  %p255_p6 = scmp.lt.s32.totalorder %s27_s15, %s27_s15 }
   0xe   :  { %p251_p5 = scmp.ne.s32.totalorder %s27_s15, %s250_s19  ;;  %p256_p7 = scmp.lt.s32.totalorder %s250_s19, %s250_s19 }
  0x10   :  { %p257_p8 = por %p256_p7, %p255_p6 }
  0x12   :  { %p258_p9 = pnand %p257_p8, %p251_p5 }
  0x14   :  { %261 = shalt.err (!%p258_p9)
}
  0x15   :  { %s290_s20 = smov 128   ;;  %s291_s21 = smov 8  }
  0x16   :  { %32 = dma.hbm_to_vmem [thread:$0]  %s328_s1, 2048, %s27_s15, [#allocation6], %s290_s20, %s290_s20, %s291_s21  }
  0x17   :  { %282 = dma.done.wait [#allocation3], 64  }
  0x18   :  { %283 = vsyncadd [#allocation3], 4294967232 }
  0x19   :  { %284 = dma.done.wait [#allocation6], 2048  }
  0x1a   :  { %285 = vsyncadd [#allocation6], 4294965248  ;;  %v292_v0 = vmov 0.0   ;;  %vm293_vm0 = vmmov 0   ;;  %v57_v1 = vld [vmem:[#allocation5 + $0x78] sm:$0xff]  ;;  %v56_v2 = vld [vmem:[#allocation5 + $0x70] sm:$0xff] }
  0x1b   :  { %176 = vmatprep.subr.mxu0 %v292_v0  ;;  %208 = vmatprep.mubr.msk.f32.mxu0 %vm293_vm0, %v292_v0  ;;  %v55_v3 = vld [vmem:[#allocation5 + $0x68] sm:$0xff]  ;;  %v54_v4 = vld [vmem:[#allocation5 + $0x60] sm:$0xff]  ;;  %v53_v5 = vld [vmem:[#allocation5 + $0x58] sm:$0xff]  ;;  %s294_s24 = smov [#allocation7]  }
  0x1c   :  { %177 = vmatpush3.msra.mxu0 %v57_v1  ;;  %v52_v6 = vld [vmem:[#allocation5 + $0x50] sm:$0xff]  ;;  %v51_v7 = vld [vmem:[#allocation5 + $0x48] sm:$0xff]  ;;  %v50_v8 = vld [vmem:[#allocation5 + $0x40] sm:$0xff]  ;;  %s148_s25 = sshll.u32 %s294_s24, 4  ;;  %s149_s25 = int_to_ptr.vmem [resolvable:$true] %s148_s25 }
  0x1d   :  { %178 = vmatprep.subr.mxu0 %v292_v0  ;;  %v49_v9 = vld [vmem:[#allocation5 + $0x38] sm:$0xff]  ;;  %v48_v10 = vld [vmem:[#allocation5 + $0x30] sm:$0xff]  ;;  %v47_v11 = vld [vmem:[#allocation5 + $0x28] sm:$0xff]  ;;  %s262_s26 = scalar_lea.vmem %s149_s25, 64  ;;  %p267_p11 = scmp.lt.s32.totalorder %s149_s25, %s149_s25 }
  0x1e   :  { %179 = vmatpush3.msra.mxu0 %v56_v2  ;;  %v46_v12 = vld [vmem:[#allocation5 + $0x20] sm:$0xff]  ;;  %v45_v13 = vld [vmem:[#allocation5 + $0x18] sm:$0xff]  ;;  %v44_v14 = vld [vmem:[#allocation5 + $0x10] sm:$0xff]  ;;  %p263_p10 = scmp.ne.s32.totalorder %s149_s25, %s262_s26  ;;  %p268_p12 = scmp.lt.s32.totalorder %s262_s26, %s262_s26 }
  0x1f   :  { %180 = vmatprep.subr.mxu0 %v292_v0  ;;  %v43_v15 = vld [vmem:[#allocation5 + $0x8] sm:$0xff]  ;;  %v42_v16 = vld [vmem:[#allocation5] sm:$0xff]  ;;  %v41_v17 = vld [vmem:[#allocation2] sm:$0xf] }
  0x20   :  { %181 = vmatpush3.msra.mxu0 %v55_v3  ;;  %v158_v18 = vld [vmem:[%s329_s2] ss:$0 sm:$0xff]  ;;  %p269_p13 = por %p268_p12, %p267_p11 }
  0x21   :  { %182 = vmatprep.subr.mxu0 %v292_v0 }
  0x22   :  { %183 = vmatpush3.msra.mxu0 %v54_v4  ;;  %p270_p0 = pnand %p269_p13, %p263_p10 }
  0x23   :  { %184 = vmatprep.subr.mxu0 %v292_v0 }
  0x24   :  { %185 = vmatpush3.msra.mxu0 %v53_v5 }
  0x25   :  { %186 = vmatprep.subr.mxu0 %v292_v0 }
  0x26   :  { %187 = vmatpush3.msra.mxu0 %v52_v6 }
  0x27   :  { %188 = vmatprep.subr.mxu0 %v292_v0 }
  0x28   :  { %189 = vmatpush3.msra.mxu0 %v51_v7 }
  0x29   :  { %190 = vmatprep.subr.mxu0 %v292_v0 }
  0x2a   :  { %191 = vmatpush3.msra.mxu0 %v50_v8 }
  0x2b   :  { %192 = vmatprep.subr.mxu0 %v292_v0 }
  0x2c   :  { %193 = vmatpush3.msra.mxu0 %v49_v9 }
  0x2d   :  { %194 = vmatprep.subr.mxu0 %v292_v0 }
  0x2e   :  { %195 = vmatpush3.msra.mxu0 %v48_v10 }
  0x2f   :  { %196 = vmatprep.subr.mxu0 %v292_v0 }
  0x30   :  { %197 = vmatpush3.msra.mxu0 %v47_v11 }
  0x31   :  { %198 = vmatprep.subr.mxu0 %v292_v0 }
  0x32   :  { %199 = vmatpush3.msra.mxu0 %v46_v12 }
  0x33   :  { %200 = vmatprep.subr.mxu0 %v292_v0 }
  0x34   :  { %201 = vmatpush3.msra.mxu0 %v45_v13 }
  0x35   :  { %202 = vmatprep.subr.mxu0 %v292_v0 }
  0x36   :  { %203 = vmatpush3.msra.mxu0 %v44_v14 }
  0x37   :  { %204 = vmatprep.subr.mxu0 %v292_v0 }
  0x38   :  { %205 = vmatpush3.msra.mxu0 %v43_v15 }
  0x39   :  { %206 = vmatprep.subr.mxu0 %v292_v0 }
  0x3a   :  { %207 = vmatpush3.msra.mxu0 %v42_v16 }
  0x3b   :  { %209 = vmatmul.mubr.f32.vlgmr.msra.gmra.mxu0 %v41_v17 }
  0xfb   :  { %v131_v19 = vpop.f32.mrf.mxu0 }
  0xfc   :  { %v132_v20 = vadd.f32 %v158_v18, %v131_v19 }
  0xfd   :  { %v210_v21 = vpop.f32.mrf.mxu0 }
  0xfe   :  { %v135_v22 = vsub.f32 0.0, %v132_v20 }
 0x100   :  { %v136_v23 = vmul.f32 1.442695, %v135_v22 }
 0x102   :  { %218 = vpow2.f32 %v136_v23 }
 0x10f   :  { %v219_v24 = vpop.eup %218 }
 0x110   :  { %v138_v25 = vadd.f32 1.0, %v219_v24 }
 0x112   :  { %220 = vrcp.f32 %v138_v25 }
 0x11f   :  { %v221_v26 = vpop.eup %220 }
 0x120   :  { %v140_v27 = vmul.f32 %v221_v26, %v221_v26 }
 0x122   :  { %141 = vst [vmem:[#allocation7] sm:$0xf] %v140_v27 }
 0x123   :  { %273 = shalt.err (!%p270_p0)
}
 0x124   :  { %151 = dma.vmem_to_hbm [thread:$0]  %s149_s25, 64, %s330_s3, [#allocation4]  }
 0x125   :  { %286 = dma.done.wait [#allocation4], 64  }
 0x126   :  { %287 = vsyncadd [#allocation4], 4294967232 }
 0x127   :  { %155 = vsyncpa [#allocation3], 1 }
 0x128   :  { %156 = vsyncpa [#allocation6], 1 }
 0x129   :  { %157 = vsyncpa [#allocation4], 1 }

</bundles_post_ra>
